<compile_context>
chip_gen: v7x
topology: tpu7x:2x2x1
jax: 0.10.0
libtpu: 0.0.40
codegen_flags: <defaults>
</compile_context>

<pallas_src>
import jax
import jax.numpy as jnp
from jax import lax
from jax.experimental import pallas as pl
from jax.experimental.pallas import tpu as pltpu

_LANE = 128          # vreg lane width
_SUBLANE = 8         # f32 sublane count
_MAX_TILE_ROWS = 512 # 512*128*4B = 256 KiB per block (fits all chips double-buffered)


def _make_kernel(tiles1, total_tiles, inv_n1, inv_n2, inv_b):
    """Builds the loss kernel with compile-time constants closed over."""

    def kernel(out_ref, tgt_ref, logits_ref, labels_ref, loss_ref, acc_ref):
        i = pl.program_id(0)

        @pl.when(i == 0)
        def _init():
            acc_ref[0] = jnp.float32(0.0)
            acc_ref[1] = jnp.float32(0.0)
            loss_ref[0, 0] = jnp.float32(0.0)

        # Lane-dense squared-error partial sum for this (tile_rows, 128) block.
        d = out_ref[...] - tgt_ref[...]
        part = jnp.sum(d * d)

        @pl.when(i < tiles1)          # tiles [0, tiles1) belong to arr1
        def _acc1():
            acc_ref[0] += part

        @pl.when(i >= tiles1)         # tiles [tiles1, total) belong to arr2
        def _acc2():
            acc_ref[1] += part

        @pl.when(i == total_tiles - 1)
        def _finalize():
            # Cross entropy with integer class targets (sum over batch; mean applied
            # via the constant reciprocal inv_b below).
            logits = logits_ref[...].astype(jnp.float32)           # (B, C)
            labels = labels_ref[...]                                # (B, 1) int32
            m = jnp.max(logits, axis=-1, keepdims=True)
            shifted = logits - m
            lse = jnp.log(jnp.sum(jnp.exp(shifted), axis=-1, keepdims=True))
            logp = shifted - lse                                    # log-softmax
            col = lax.broadcasted_iota(jnp.int32, logits.shape, 1)  # (B, C)
            onehot = (col == labels).astype(jnp.float32)
            ce_sum = -jnp.sum(onehot * logp)

            # Deferred normalization: single combine with constant reciprocals.
            loss_ref[0, 0] = (acc_ref[0] * inv_n1
                              + acc_ref[1] * inv_n2
                              + ce_sum * inv_b)

    return kernel


def _pad_flat(x, total_elems):
    """Flatten to f32 1-D and zero-pad up to total_elems."""
    x = x.reshape(-1).astype(jnp.float32)
    pad = total_elems - x.shape[0]
    if pad > 0:
        x = jnp.concatenate([x, jnp.zeros((pad,), jnp.float32)])
    return x


def complex_tuple_loss(output, target):
    """output = ((arr1, arr2), logits) ; target = ((arr1_t, arr2_t), class_idx)."""
    (o1, o2), logits = output
    (t1, t2), labels = target

    n1 = int(o1.size)
    n2 = int(o2.size)
    B, C = logits.shape

    # Lane-dense tiling: pack each MSE operand into rows of 128 lanes, round the
    # row count per array up to a whole number of tiles, then concatenate so one
    # grid walks both arrays (arr1 tiles first, then arr2 tiles).
    rows1 = -(-n1 // _LANE)
    rows2 = -(-n2 // _LANE)
    tile_rows = min(_MAX_TILE_ROWS,
                    ((max(rows1, rows2, 1) + _SUBLANE - 1) // _SUBLANE) * _SUBLANE)
    tiles1 = max(1, -(-rows1 // tile_rows))
    tiles2 = max(1, -(-rows2 // tile_rows))
    total_tiles = tiles1 + tiles2
    elems1 = tiles1 * tile_rows * _LANE
    elems2 = tiles2 * tile_rows * _LANE

    out_slab = jnp.concatenate(
        [_pad_flat(o1, elems1), _pad_flat(o2, elems2)]).reshape(-1, _LANE)
    tgt_slab = jnp.concatenate(
        [_pad_flat(t1, elems1), _pad_flat(t2, elems2)]).reshape(-1, _LANE)
    labels2d = labels.astype(jnp.int32).reshape(B, 1)
    logits_f32 = logits.astype(jnp.float32)

    kernel = _make_kernel(tiles1, total_tiles,
                          1.0 / n1, 1.0 / n2, 1.0 / B)

    cost = pl.CostEstimate(
        flops=3 * (elems1 + elems2) + 6 * B * C,
        transcendentals=B * C + B,
        bytes_accessed=4 * (2 * (elems1 + elems2) + B * C + B) + 4,
    )

    grid_spec = pltpu.PrefetchScalarGridSpec(
        num_scalar_prefetch=0,
        grid=(total_tiles,),
        in_specs=[
            pl.BlockSpec((tile_rows, _LANE), lambda i: (i, 0)),   # packed outputs
            pl.BlockSpec((tile_rows, _LANE), lambda i: (i, 0)),   # packed targets
            pl.BlockSpec((B, C), lambda i: (0, 0)),               # logits, resident
            pl.BlockSpec((B, 1), lambda i: (0, 0)),               # labels, resident
        ],
        out_specs=pl.BlockSpec((1, 1), lambda i: (0, 0),
                               memory_space=pltpu.MemorySpace.SMEM),
        scratch_shapes=[pltpu.SMEM((2,), jnp.float32)],           # [sum_sq1, sum_sq2]
    )

    res = pl.pallas_call(
        kernel,
        out_shape=jax.ShapeDtypeStruct((1, 1), jnp.float32),
        grid_spec=grid_spec,
        compiler_params=pltpu.CompilerParams(
            dimension_semantics=("arbitrary",)),
        cost_estimate=cost,
    )(out_slab, tgt_slab, logits_f32, labels2d)
    return res[0, 0]


if __name__ == "__main__":
    key = jax.random.PRNGKey(0)
    k1, k2, k3, k4, k5, k6 = jax.random.split(key, 6)

    B, H, W = 2, 16, 16     # arr1 shape
    S, D = 8, 32            # arr2 shape
    C = 8                   # number of classes

    out_arr1 = jax.random.normal(k1, (B, H, W), dtype=jnp.float32)
    tgt_arr1 = jax.random.normal(k2, (B, H, W), dtype=jnp.float32)
    out_arr2 = jax.random.normal(k3, (B, S, D), dtype=jnp.float32)
    tgt_arr2 = jax.random.normal(k4, (B, S, D), dtype=jnp.float32)
    logits = jax.random.normal(k5, (B, C), dtype=jnp.float32)
    labels = jax.random.randint(k6, (B,), 0, C, dtype=jnp.int32)

    output = ((out_arr1, out_arr2), logits)
    target = ((tgt_arr1, tgt_arr2), labels)

    loss = complex_tuple_loss(output, target)
    jax.block_until_ready(loss)

    # Pure-JAX reference check
    ref_mse1 = jnp.mean((out_arr1 - tgt_arr1) ** 2)
    ref_mse2 = jnp.mean((out_arr2 - tgt_arr2) ** 2)
    ref_logp = jax.nn.log_softmax(logits, axis=-1)
    ref_ce = -jnp.mean(ref_logp[jnp.arange(B), labels])
    ref = ref_mse1 + ref_mse2 + ref_ce
    assert jnp.allclose(loss, ref, rtol=1e-5, atol=1e-5), (loss, ref)

    print("KERNEL_OK")
</pallas_src>

<mosaic_0001>
module attributes {stable_mosaic.version = 11 : i64} {
  func.func @kernel(%arg0: i32, %arg1: memref<8x128xf32, #tpu.memory_space<vmem>>, %arg2: memref<8x128xf32, #tpu.memory_space<vmem>>, %arg3: memref<2x8xf32, #tpu.memory_space<vmem>>, %arg4: memref<2x1xi32, #tpu.memory_space<vmem>>, %arg5: memref<1x1xf32, #tpu.memory_space<smem>>, %arg6: memref<2xf32, #tpu.memory_space<smem>>) attributes {dimension_semantics = [#tpu.dimension_semantics<arbitrary>], iteration_bounds = array<i64: 2>, scalar_prefetch = 0 : i64, scratch_operands = 1 : i64, tpu.core_type = #tpu.core_type<tc>, window_params = [{transform_indices = @transform_0, window_bounds = array<i64: 8, 128>}, {transform_indices = @transform_1, window_bounds = array<i64: 8, 128>}, {pipeline_mode = #tpu.pipeline_mode<synchronous>, transform_indices = @transform_2, window_bounds = array<i64: 2, 8>}, {pipeline_mode = #tpu.pipeline_mode<synchronous>, transform_indices = @transform_3, window_bounds = array<i64: 2, 1>}, {transform_indices = @transform_4, window_bounds = array<i64: 1, 1>}]} {
    %c0_i32 = arith.constant 0 : i32
    %0 = arith.cmpi eq, %arg0, %c0_i32 : i32
    %1 = arith.extui %0 : i1 to i32
    %c0_i32_0 = arith.constant 0 : i32
    %2 = arith.cmpi ne, %1, %c0_i32_0 : i32
    scf.if %2 {
      %cst_9 = arith.constant 0.000000e+00 : f32
      %c0_10 = arith.constant 0 : index
      %20 = memref.load %arg6[%c0_10] : memref<2xf32, #tpu.memory_space<smem>>
      memref.store %cst_9, %arg6[%c0_10] : memref<2xf32, #tpu.memory_space<smem>>
      %cst_11 = arith.constant 0.000000e+00 : f32
      %c1 = arith.constant 1 : index
      %21 = memref.load %arg6[%c1] : memref<2xf32, #tpu.memory_space<smem>>
      memref.store %cst_11, %arg6[%c1] : memref<2xf32, #tpu.memory_space<smem>>
      %cst_12 = arith.constant 0.000000e+00 : f32
      %c0_13 = arith.constant 0 : index
      %c0_14 = arith.constant 0 : index
      %22 = memref.load %arg5[%c0_13, %c0_14] : memref<1x1xf32, #tpu.memory_space<smem>>
      memref.store %cst_12, %arg5[%c0_13, %c0_14] : memref<1x1xf32, #tpu.memory_space<smem>>
    } else {
    }
    %c0 = arith.constant 0 : index
    %c0_1 = arith.constant 0 : index
    %3 = vector.load %arg1[%c0, %c0_1] : memref<8x128xf32, #tpu.memory_space<vmem>>, vector<8x128xf32>
    %c0_2 = arith.constant 0 : index
    %c0_3 = arith.constant 0 : index
    %4 = vector.load %arg2[%c0_2, %c0_3] : memref<8x128xf32, #tpu.memory_space<vmem>>, vector<8x128xf32>
    %5 = arith.subf %3, %4 : vector<8x128xf32>
    %6 = arith.mulf %5, %5 : vector<8x128xf32>
    %7 = vector.shape_cast %6 : vector<8x128xf32> to vector<1x8x128xf32>
    %cst = arith.constant dense<0.000000e+00> : vector<1xf32>
    %8 = vector.multi_reduction <add>, %7, %cst [1, 2] : vector<1x8x128xf32> to vector<1xf32>
    %9 = vector.shape_cast %8 : vector<1xf32> to vector<1x1x1xf32>
    %10 = vector.extract %9[0, 0, 0] : f32 from vector<1x1x1xf32>
    %c1_i32 = arith.constant 1 : i32
    %11 = arith.cmpi slt, %arg0, %c1_i32 : i32
    %12 = arith.extui %11 : i1 to i32
    %c0_i32_4 = arith.constant 0 : i32
    %13 = arith.cmpi ne, %12, %c0_i32_4 : i32
    scf.if %13 {
      %c0_9 = arith.constant 0 : index
      %20 = memref.load %arg6[%c0_9] : memref<2xf32, #tpu.memory_space<smem>>
      %21 = arith.addf %20, %10 : f32
      %c0_10 = arith.constant 0 : index
      %22 = memref.load %arg6[%c0_10] : memref<2xf32, #tpu.memory_space<smem>>
      memref.store %21, %arg6[%c0_10] : memref<2xf32, #tpu.memory_space<smem>>
    } else {
    }
    %c1_i32_5 = arith.constant 1 : i32
    %14 = arith.cmpi sge, %arg0, %c1_i32_5 : i32
    %15 = arith.extui %14 : i1 to i32
    %c0_i32_6 = arith.constant 0 : i32
    %16 = arith.cmpi ne, %15, %c0_i32_6 : i32
    scf.if %16 {
      %c1 = arith.constant 1 : index
      %20 = memref.load %arg6[%c1] : memref<2xf32, #tpu.memory_space<smem>>
      %21 = arith.addf %20, %10 : f32
      %c1_9 = arith.constant 1 : index
      %22 = memref.load %arg6[%c1_9] : memref<2xf32, #tpu.memory_space<smem>>
      memref.store %21, %arg6[%c1_9] : memref<2xf32, #tpu.memory_space<smem>>
    } else {
    }
    %c1_i32_7 = arith.constant 1 : i32
    %17 = arith.cmpi eq, %arg0, %c1_i32_7 : i32
    %18 = arith.extui %17 : i1 to i32
    %c0_i32_8 = arith.constant 0 : i32
    %19 = arith.cmpi ne, %18, %c0_i32_8 : i32
    scf.if %19 {
      %c0_9 = arith.constant 0 : index
      %c0_10 = arith.constant 0 : index
      %20 = vector.load %arg3[%c0_9, %c0_10] : memref<2x8xf32, #tpu.memory_space<vmem>>, vector<2x8xf32>
      %c0_11 = arith.constant 0 : index
      %c0_12 = arith.constant 0 : index
      %21 = vector.load %arg4[%c0_11, %c0_12] : memref<2x1xi32, #tpu.memory_space<vmem>>, vector<2x1xi32>
      %cst_13 = arith.constant dense<0xFF800000> : vector<2xf32>
      %22 = vector.multi_reduction <maximumf>, %20, %cst_13 [1] : vector<2x8xf32> to vector<2xf32>
      %23 = vector.shape_cast %22 : vector<2xf32> to vector<2x1xf32>
      %24 = vector.broadcast %23 : vector<2x1xf32> to vector<2x8xf32>
      %25 = arith.subf %20, %24 : vector<2x8xf32>
      %26 = math.exp %25 : vector<2x8xf32>
      %cst_14 = arith.constant dense<0.000000e+00> : vector<2xf32>
      %27 = vector.multi_reduction <add>, %26, %cst_14 [1] : vector<2x8xf32> to vector<2xf32>
      %28 = vector.shape_cast %27 : vector<2xf32> to vector<2x1xf32>
      %29 = math.log %28 : vector<2x1xf32>
      %30 = vector.broadcast %29 : vector<2x1xf32> to vector<2x8xf32>
      %31 = arith.subf %25, %30 : vector<2x8xf32>
      %32 = tpu.iota {dimensions = array<i32: 1>} : vector<2x8xi32>
      %33 = vector.broadcast %21 : vector<2x1xi32> to vector<2x8xi32>
      %34 = arith.cmpi eq, %32, %33 : vector<2x8xi32>
      %35 = arith.extui %34 : vector<2x8xi1> to vector<2x8xi32>
      %36 = arith.sitofp %35 : vector<2x8xi32> to vector<2x8xf32>
      %37 = arith.mulf %36, %31 : vector<2x8xf32>
      %38 = vector.shape_cast %37 : vector<2x8xf32> to vector<1x2x8xf32>
      %cst_15 = arith.constant dense<0.000000e+00> : vector<1xf32>
      %39 = vector.multi_reduction <add>, %38, %cst_15 [1, 2] : vector<1x2x8xf32> to vector<1xf32>
      %40 = vector.shape_cast %39 : vector<1xf32> to vector<1x1x1xf32>
      %41 = vector.extract %40[0, 0, 0] : f32 from vector<1x1x1xf32>
      %cst_16 = arith.constant 0.000000e+00 : f32
      %42 = arith.subf %cst_16, %41 : f32
      %c0_17 = arith.constant 0 : index
      %43 = memref.load %arg6[%c0_17] : memref<2xf32, #tpu.memory_space<smem>>
      %cst_18 = arith.constant 0.001953125 : f32
      %44 = arith.mulf %43, %cst_18 : f32
      %c1 = arith.constant 1 : index
      %45 = memref.load %arg6[%c1] : memref<2xf32, #tpu.memory_space<smem>>
      %cst_19 = arith.constant 0.001953125 : f32
      %46 = arith.mulf %45, %cst_19 : f32
      %47 = arith.addf %44, %46 : f32
      %cst_20 = arith.constant 5.000000e-01 : f32
      %48 = arith.mulf %42, %cst_20 : f32
      %49 = arith.addf %47, %48 : f32
      %c0_21 = arith.constant 0 : index
      %c0_22 = arith.constant 0 : index
      %50 = memref.load %arg5[%c0_21, %c0_22] : memref<1x1xf32, #tpu.memory_space<smem>>
      memref.store %49, %arg5[%c0_21, %c0_22] : memref<1x1xf32, #tpu.memory_space<smem>>
    } else {
    }
    return
  }
  func.func @transform_0(%arg0: i32) -> (i32, i32) {
    %c0_i32 = arith.constant 0 : i32
    %c0_i32_0 = arith.constant 0 : i32
    return %arg0, %c0_i32 : i32, i32
  }
  func.func @transform_1(%arg0: i32) -> (i32, i32) {
    %c0_i32 = arith.constant 0 : i32
    %c0_i32_0 = arith.constant 0 : i32
    return %arg0, %c0_i32 : i32, i32
  }
  func.func @transform_2(%arg0: i32) -> (i32, i32) {
    %c0_i32 = arith.constant 0 : i32
    %c0_i32_0 = arith.constant 0 : i32
    %c0_i32_1 = arith.constant 0 : i32
    return %c0_i32, %c0_i32_0 : i32, i32
  }
  func.func @transform_3(%arg0: i32) -> (i32, i32) {
    %c0_i32 = arith.constant 0 : i32
    %c0_i32_0 = arith.constant 0 : i32
    %c0_i32_1 = arith.constant 0 : i32
    return %c0_i32, %c0_i32_0 : i32, i32
  }
  func.func @transform_4(%arg0: i32) -> (i32, i32) {
    %c0_i32 = arith.constant 0 : i32
    %c0_i32_0 = arith.constant 0 : i32
    %c0_i32_1 = arith.constant 0 : i32
    return %c0_i32, %c0_i32_0 : i32, i32
  }
}

</mosaic_0001>

<bundles_post_ra>
// kernel: tpu_custom_call.1
= control target key start
LH: loop header
LB: loop body
LE: loop exit
PB: predicated region body
PF: predicated region fallthrough
CT: control target
= control target key end

     0   :  { %9 = vsyncpa [#allocation4], 0  ;;  %s829_s0 = inlined_call_operand.hbm [shape: f32[16,128], index: 0, kind: input, shape index: {}]   ;;  %s830_s1 = inlined_call_operand.hbm [shape: f32[16,128], index: 1, kind: input, shape index: {}]   ;;  %s831_s2 = inlined_call_operand.vmem [shape: f32[2,8], index: 2, kind: input, shape index: {}]   ;;  %s832_s3 = inlined_call_operand.vmem [shape: s32[2,1], index: 3, kind: input, shape index: {}]   ;;  %s833_s4 = inlined_call_operand.hbm [shape: f32[1,1], index: 4, kind: output, shape index: {}]  }
   0x1   :  { %11 = vsyncpa [#allocation4 + $0x1], 0 }
   0x2   :  { %12 = vsyncpa [#allocation7], 0 }
   0x3   :  { %14 = vsyncpa [#allocation7 + $0x1], 0 }
   0x4   :  { %15 = vsyncpa [#allocation5], 0  ;;  %s647_s15 = smov 0   ;;  %s649_s16 = smov 0  }
   0x5   :  { %s651_s17 = smov 0   ;;  %s653_s18 = smov 0  }
   0x6 LB: > { %s666_s19 = sadd.s32 4294967295, %s614_s18   ;;  %s669_s20 = sadd.s32 1, %s614_s18   ;;  %s614_s18 = sphi %s653_s18, %s849_s18   ;;  %s610_s17 = sphi %s651_s17, %s848_s17   ;;  %s606_s16 = sphi %s649_s16, %s847_s16   ;;  %s602_s15 = sphi %s647_s15, %s846_s15  }
   0x7   : > { %s25_s21 = ssub.s32 %s614_s18, %s669_s20  ;;  %s28_s22 = sadd.s32 1, %s610_s17 }
   0x8   : > { %p26_p0 = scmp.eq.s32.totalorder %s25_s21, 0  ;;  %p35_p1 = scmp.ne.s32.totalorder %s610_s17, %s606_s16 }
   0x9   : > { %p36_p2 = scmp.eq.s32.totalorder %s614_s18, 0  ;;  %p41_p3 = scmp.ne.s32.totalorder %s606_s16, %s602_s15 }
   0xa   : > { %s679_s23 = scalar_select %p26_p0, %s610_s17, %s28_s22  }
   0xb   : > { %p37_p4 = por %p36_p2, %p35_p1  ;;  %p834_p5 = scmp.eq.s32.totalorder %s666_s19, 0 }
   0xc   : > { %p452_p6 = scmp.lt.s32.totalorder %s614_s18, 2  ;;  %s690_s25 = sand.u32 1, %s610_s17  }
   0xd   : > { %p685_p7 = por %p834_p5, %p41_p3  ;;  %s407_s26 = sshll.u32 %s690_s25, 3 }
   0xe   : > { %s408_s27 = sshll.u32 %s614_s18, 7  ;;  %s164_s5 = scalar_lea.vmem [#allocation3], %s407_s26 }
   0xf   : > { %s836_s24 = scalar_select %p685_p7, 1, 0 }
  0x10   : > { %s699_s30 = scalar_lea.hbm %s829_s0, %s408_s27  ;;  %s171_s6 = sshll.u32 %s164_s5, 4  ;;  %s703_s6 = int_to_ptr.vmem [resolvable:$true] %s171_s6 }
  0x11   : > { %p705_p8 = pnand %p452_p6, %p37_p4  ;;  %s161_s8 = scalar_lea.sflag [#allocation4], %s690_s25 }
  0x12   : > { %s500_s9 = scalar_lea.hbm %s699_s30, 128  ;;  %s505_s12 = scalar_lea.hbm %s829_s0, 256 }
  0x13   : > { %p501_p11 = scmp.ne.s32.totalorder %s699_s30, %s500_s9  ;;  %p502_p12 = pneg %p705_p8 }
  0x14   : > { %p506_p1 = scmp.lt.u32.totalorder %s699_s30, %s829_s0  ;;  %p507_p2 = scmp.lt.u32.totalorder %s505_s12, %s500_s9 }
  0x15   : > { %p503_p13 = pnand %p502_p12, %p501_p11  ;;  %p509_p4 = scmp.lt.u32.totalorder %s500_s9, %s699_s30 }
  0x16   : > { %p508_p3 = por %p507_p2, %p506_p1 }
  0x17   : > { %p504_p0 = pneg %p503_p13 }
  0x18   : > { %p510_p6 = por %p509_p4, %p508_p3 }
  0x1a   : > { %p511_p5 = pnand %p510_p6, %p504_p0 }
  0x1c   : > { %514 = shalt.err (!%p511_p5)
}
  0x1d   : > { %s515_s15 = scalar_lea.vmem %s703_s6, 128  ;;  %s616_s21 = smov [#allocation3]  }
  0x1e   : > { %p516_p11 = scmp.ne.s32.totalorder %s703_s6, %s515_s15  ;;  %s520_s22 = sshll.u32 %s616_s21, 4  ;;  %s521_s22 = int_to_ptr.vmem [resolvable:$false] %s520_s22 }
  0x1f   : > { %s522_s28 = scalar_lea.vmem %s521_s22, 256  ;;  %p523_p10 = scmp.lt.s32.totalorder %s703_s6, %s521_s22 }
  0x20   : > { %p518_p13 = pnand %p516_p11, %p502_p12  ;;  %p524_p1 = scmp.lt.s32.totalorder %s522_s28, %s515_s15 }
  0x22   : > { %p519_p9 = pneg %p518_p13  ;;  %p525_p2 = por %p524_p1, %p523_p10 }
  0x24   : > { %p526_p3 = pnand %p525_p2, %p519_p9 }
  0x26   : > { %529 = shalt.err (!%p526_p3)
}
  0x27   : > { %448 = dma.hbm_to_vmem [thread:$0]  (!%p705_p8), %s699_s30, 128, %s703_s6, %s161_s8  }
  0x28   : > { %p838_p5 = scmp.lt.s32.totalorder %s614_s18, 3  ;;  %p839_p0 = scmp.ge.s32.totalorder %s614_s18, 1 }
  0x29   : > { %s750_s10 = scalar_lea.hbm %s830_s1, %s408_s27  ;;  %s182_s11 = scalar_lea.vmem [#allocation6], %s407_s26 }
  0x2a   : > { %p741_p4 = pnand %p839_p0, %p838_p5  ;;  %s189_s12 = sshll.u32 %s182_s11, 4  ;;  %s190_s12 = int_to_ptr.vmem [resolvable:$true] %s189_s12 }
  0x2b   : > { %s179_s30 = scalar_lea.sflag [#allocation7], %s690_s25  ;;  %s530_s6 = scalar_lea.hbm %s750_s10, 128 }
  0x2c   : > { %s840_s29 = scalar_select %p741_p4, 1, 0 }
  0x2d   : > { %p531_p9 = scmp.ne.s32.totalorder %s750_s10, %s530_s6  ;;  %s535_s27 = scalar_lea.hbm %s830_s1, 256 }
  0x2e   : > { %p536_p11 = scmp.lt.u32.totalorder %s750_s10, %s830_s1  ;;  %p537_p13 = scmp.lt.u32.totalorder %s535_s27, %s530_s6 }
  0x2f   : > { %p533_p10 = pnand %p531_p9, %p502_p12  ;;  %p539_p2 = scmp.lt.u32.totalorder %s530_s6, %s750_s10 }
  0x30   : > { %p538_p1 = por %p537_p13, %p536_p11 }
  0x31   : > { %p534_p6 = pneg %p533_p10 }
  0x32   : > { %p540_p3 = por %p539_p2, %p538_p1 }
  0x34   : > { %p541_p5 = pnand %p540_p3, %p534_p6 }
  0x36   : > { %544 = shalt.err (!%p541_p5)
}
  0x37   : > { %s545_s25 = scalar_lea.vmem %s190_s12, 128  ;;  %s617_s26 = smov [#allocation6]  }
  0x38   : > { %p546_p0 = scmp.ne.s32.totalorder %s190_s12, %s545_s25  ;;  %s550_s15 = sshll.u32 %s617_s26, 4  ;;  %s551_s15 = int_to_ptr.vmem [resolvable:$false] %s550_s15 }
  0x39   : > { %s552_s21 = scalar_lea.vmem %s551_s15, 256  ;;  %p553_p7 = scmp.lt.s32.totalorder %s190_s12, %s551_s15 }
  0x3a   : > { %p548_p9 = pnand %p546_p0, %p502_p12  ;;  %p554_p4 = scmp.lt.s32.totalorder %s552_s21, %s545_s25 }
  0x3c   : > { %p549_p10 = pneg %p548_p9  ;;  %p555_p11 = por %p554_p4, %p553_p7 }
  0x3e   : > { %p556_p13 = pnand %p555_p11, %p549_p10 }
  0x40   : > { %559 = shalt.err (!%p556_p13)
}
  0x41   : > { %451 = dma.hbm_to_vmem [thread:$0]  (!%p705_p8), %s750_s10, 128, %s190_s12, %s179_s30  }
  0x42   : > { %p841_p6 = scmp.ne.s32.totalorder %s840_s29, 0 }
  0x43   : > { %s200_s22 = sand.u32 (!%p841_p6), 1, %s606_s16   ;;  %p842_p12 = scmp.ne.s32.totalorder (!%p841_p6), %s836_s24, 0 }
  0x44   : > { %198 = sbr.rel (%p841_p6) target bundleno = 631 (0x277), region = 36  ;;  %s412_s28 = sshll.u32 (!%p841_p6), %s200_s22, 3 }
  0x45   : > { %s201_s5 = scalar_lea.sflag (!%p841_p6), [#allocation4], %s200_s22  ;;  %s204_s9 = scalar_lea.vmem (!%p841_p6), [#allocation3], %s412_s28 }
  0x4b   : > { %589 = dma.done.wait (%p842_p12), %s201_s5, 128  }
  0x4c   : > { %591 = vsyncadd (%p842_p12), %s201_s5, 4294967168  ;;  %s210_s11 = scalar_lea.sflag [#allocation7], %s200_s22  ;;  %s213_s6 = scalar_lea.vmem [#allocation6], %s412_s28 }
  0x4d   : > { %593 = dma.done.wait (%p842_p12), %s210_s11, 128  }
  0x4e   : > { %595 = vsyncadd (%p842_p12), %s210_s11, 4294967168  ;;  %v248_v0 = vld [vmem:[%s204_s9] sm:$0xff]  ;;  %v249_v1 = vld [vmem:[%s213_s6] sm:$0xff]  ;;  %s618_s7 = smov 0.0   ;;  %p843_p7 = scmp.eq.s32.totalorder %s666_s19, 0 }
  0x4f   : > { %v250_v2 = vsub.f32 %v248_v0, %v249_v1  ;;  %p454_p1 = scmp.lt.s32.totalorder %s666_s19, 1  ;;  %p415_p2 = scmp.ge.s32.totalorder %s666_s19, 1 }
  0x50   : > { %434 = sst [smem:[#allocation2]] (%p843_p7), %s618_s7  ;;  %p844_p8 = pmov %p843_p7 }
  0x51   : > { %v251_v3 = vmul.f32 %v250_v2, %v250_v2  ;;  %p845_p4 = pmov %p843_p7  ;;  %s265_s24 = sld [smem:[#allocation2]] }
  0x52   : > { %435 = sst [smem:[#allocation2 + $0x1]] (%p844_p8), %s618_s7  ;;  %p418_p3 = scmp.ne.s32.totalorder %s666_s19, 1 }
  0x53   : > { %252 = vadd.xlane.f32.xlu0 %v251_v3  ;;  %436 = sst [smem:[#allocation8]] (%p845_p4), %s618_s7  ;;  %s417_s29 = sld [smem:[#allocation2 + $0x1]]  ;;  %v281_v11 = vld [vmem:[%s831_s2] sm:$0x3] (!%p418_p3)  ;;  %vm283_vm0 = vcmask (!%p418_p3), 58368   ;;  %v619_v14 = vmov (!%p418_p3), 0   ;;  %v296_v21 = vlaneseq (!%p418_p3) }
  0x54   : > { %v284_v12 = vsel (!%p418_p3), %vm283_vm0, %v281_v11, -inf  ;;  %v282_v13 = vld [vmem:[%s832_s3] sm:$0x3] (!%p418_p3)  ;;  %494 = vset.pattern.permute.xlu1 (!%p418_p3), %v619_v14  ;;  %495 = vset.pattern.permute.xlu0 (!%p418_p3), %v619_v14  ;;  %v620_v26 = vmov (!%p418_p3), 0.0  }
  0x55   : > { %299 = vperm.xlu1 (!%p418_p3), %494, %v282_v13   ;;  %v297_v22 = vand.u32 (!%p418_p3), 127, %v296_v21 }
  0x57   : > { %285 = vmax.xlane.f32.xlu0 (!%p418_p3), %v284_v12 }
  0xd4   : > { %v300_v23 = vpop.permute.xlu1 (!%p418_p3), %299 }
  0xd5   : > { %vm301_vm1 = vcmp.eq.s32.totalorder (!%p418_p3), %v297_v22, %v300_v23 }
  0xd6   : > { %v419_v27 = vsel (!%p418_p3), %vm301_vm1, 1.0, %v620_v26 }
  0xe0   : > { %v253_v4 = vpop.xlane.xlu0 %252 }
  0xe1   : > { %v254_v5 = vrot.slane %v253_v4, 4 }
  0xe3   : > { %v255_v6 = vadd.f32 %v254_v5, %v253_v4 }
  0xe4   : > { %v286_v15 = vpop.xlane.xlu0 (!%p418_p3), %285 }
  0xe5   : > { %v256_v7 = vrot.slane %v255_v6, 2  ;;  %v287_v16 = vsub.f32 (!%p418_p3), %v281_v11, %v286_v15 }
  0xe7   : > { %v257_v8 = vadd.f32 %v256_v7, %v255_v6  ;;  %v288_v17 = vmul.f32 (!%p418_p3), 1.442695, %v287_v16 }
  0xe9   : > { %v258_v9 = vrot.slane %v257_v8, 1  ;;  %496 = vpow2.f32 (!%p418_p3), %v288_v17 }
  0xeb   : > { %v259_v10 = vadd.f32 %v258_v9, %v257_v8 }
  0xed   : > { %425 = vpush %v259_v10 }
  0xf3   : > { %v497_v18 = vpop.eup (!%p418_p3), %496 }
  0xf4   : > { %v290_v19 = vsel (!%p418_p3), %vm283_vm0, %v497_v18, 0.0 }
  0xf5   : > { %291 = vadd.xlane.f32.xlu0 (!%p418_p3), %v290_v19 }
 0x11c   : > { %280 = sbr.rel (%p418_p3) target bundleno = 616 (0x268), region = 60 }
 0x11e   : > { %s426_s10 = spop %425 }
 0x11f   : > { %s266_s12 = sadd.f32 %s426_s10, %s265_s24 }
 0x120   : > { %s274_s30 = sadd.f32 %s426_s10, %s417_s29 }
 0x121   : > { %438 = sst [smem:[#allocation2]] (%p454_p1), %s266_s12 }
 0x122   : > { %440 = sst [smem:[#allocation2 + $0x1]] (%p415_p2), %s274_s30  ;;  %s316_s14 = sld [smem:[#allocation2]] (!%p418_p3) }
 0x123   : > { %s420_s25 = sld [smem:[#allocation2 + $0x1]] }
 0x128   : > { %s317_s26 = smul.f32 0.001953125, %s316_s14 }
 0x129   : > { %s319_s15 = smul.f32 0.001953125, %s420_s25 }
 0x12b   : > { %s320_s22 = sadd.f32 %s319_s15, %s317_s26 }
 0x182   : > { %v292_v20 = vpop.xlane.xlu0 %291 }
 0x183   : > { %498 = vlog2.f32 %v292_v20 }
 0x18d   : > { %v499_v24 = vpop.eup %498 }
 0x18e   : > { %v294_v25 = vmul.f32 0.6931472, %v499_v24 }
 0x190   : > { %v295_v28 = vsub.f32 %v287_v16, %v294_v25 }
 0x192   : > { %v304_v29 = vmul.f32 %v419_v27, %v295_v28 }
 0x194   : > { %v305_v30 = vsel %vm283_vm0, %v304_v29, 0.0 }
 0x195   : > { %306 = vadd.xlane.f32.xlu1 %v305_v30 }
 0x222   : > { %v307_v31 = vpop.xlane.xlu1 %306 }
 0x223   : > { %v308_v32 = vrot.slane %v307_v31, 4 }
 0x225   : > { %v309_v33 = vadd.f32 %v308_v32, %v307_v31 }
 0x227   : > { %v310_v34 = vrot.slane %v309_v33, 2 }
 0x229   : > { %v311_v35 = vadd.f32 %v310_v34, %v309_v33 }
 0x22b   : > { %v312_v36 = vrot.slane %v311_v35, 1 }
 0x22d   : > { %v313_v37 = vadd.f32 %v312_v36, %v311_v35 }
 0x22f   : > { %427 = vpush %v313_v37 }
 0x260   : > { %s428_s21 = spop %427 }
 0x261   : > { %s315_s28 = ssub.f32 0.0, %s428_s21 }
 0x263   : > { %s321_s5 = smul.f32 0.5, %s315_s28 }
 0x265   : > { %s322_s9 = sadd.f32 %s321_s5, %s320_s22 }
 0x267   : > { %324 = sst [smem:[#allocation8]] %s322_s9 }
 0x268 PF: > { %p456_p5 = scmp.eq.s32.totalorder %s666_s19, 1  ;;  %s560_s7 = scalar_lea.hbm %s833_s4, 16 }
 0x269   : > { %p561_p0 = scmp.ne.s32.totalorder %s833_s4, %s560_s7  ;;  %p566_p11 = scmp.lt.u32.totalorder %s560_s7, %s833_s4 }
 0x26b   : > { %p562_p9 = pnand %p561_p0, %p456_p5 }
 0x26d   : > { %p563_p10 = pneg %p562_p9 }
 0x26f   : > { %p568_p13 = pnand %p566_p11, %p563_p10 }
 0x271   : > { %571 = shalt.err (!%p568_p13)
}
 0x272   : > { %s621_s30 = smov [#allocation8]  }
 0x273   : > { %442 = dma.smem_to_hbm (%p456_p5), %s621_s30, 16, %s833_s4, [#allocation5]  }
 0x274   : > { %597 = dma.done.wait (%p456_p5), [#allocation5], 16  }
 0x275   : > { %599 = vsyncadd (%p456_p5), [#allocation5], 4294967280 }
 0x276   : > { %338 = sfence }
 0x277 PF: > { %p18_p6 = scmp.ge.s32.totalorder %s669_s20, 4   ;;  %s846_s15 = smov %s606_s16 }
 0x278   : > { %s847_s16 = smov %s610_s17  ;;  %s848_s17 = smov %s679_s23 }
 0x279   : > { %s849_s18 = smov %s669_s20  ;;  %20 = sbr.rel (!%p18_p6) target bundleno = 6 (0x6), region = 108 }
 0x280   :  { %344 = vsyncpa [#allocation4], 1 }
 0x281   :  { %346 = vsyncpa [#allocation4 + $0x1], 1 }
 0x282   :  { %347 = vsyncpa [#allocation7], 1 }
 0x283   :  { %349 = vsyncpa [#allocation7 + $0x1], 1 }
 0x284   :  { %350 = vsyncpa [#allocation5], 1 }
 0x285   :  { %352 = vsyncpa [#allocation5 + $0x1], 1 }

</bundles_post_ra>
